<compile_context>
chip_gen: v7x
topology: tpu7x:2x2x1
jax: 0.10.0
libtpu: 0.0.40
codegen_flags: <defaults>
</compile_context>

<pallas_src>
import functools

import jax
import jax.numpy as jnp
from jax.experimental import pallas as pl
from jax.experimental.pallas import tpu as pltpu


def _round_up(x: int, m: int) -> int:
    return ((x + m - 1) // m) * m


# ----------------------------------------------------------------------------
# Fused Pallas kernel: all SAGE layers + readout in one invocation
# ----------------------------------------------------------------------------
def _gnn_fused_kernel(*refs, reassoc, f_pad):
    """refs = (adj_norm, h0,
               <per layer: [w_stack, b]  or  [w_self, w_neigh, b] if reassoc>,
               w_ro_h0, w_ro_h, b_ro,           # inputs
               o_ref,                           # output (N, 1)
               lhs_slab)                        # VMEM scratch (N, 2*f_pad)
    """
    n_layers = len(reassoc)
    adj_ref, h0_ref = refs[0], refs[1]
    pos = 2
    layer_refs = []
    for ra in reassoc:
        k = 3 if ra else 2
        layer_refs.append(refs[pos:pos + k])
        pos += k
    wro_h0_ref, wro_h_ref, bro_ref = refs[pos], refs[pos + 1], refs[pos + 2]
    o_ref = refs[pos + 3]
    lhs_ref = refs[pos + 4]
    assert len(refs) == pos + 5

    adj = adj_ref[...]          # (N, N) row-normalized weighted adjacency
    h0 = h0_ref[...]            # (N, F0) = concat(features, ones)

    # Zero the packing slab once: padded weight rows are zero, so anything we
    # never overwrite contributes exactly 0 (and can't be a stale NaN).
    if not all(reassoc):
        lhs_ref[...] = jnp.zeros_like(lhs_ref)

    h = h0
    for l, ra in enumerate(reassoc):
        f_in = h.shape[1]
        if ra:
            # F_out < F_in: reassociate so the N^2 matmul has width F_out.
            ws_ref, wn_ref, b_ref = layer_refs[l]
            hp = jnp.dot(h, wn_ref[...], preferred_element_type=jnp.float32)
            out = (jnp.dot(h, ws_ref[...], preferred_element_type=jnp.float32)
                   + jnp.dot(adj, hp, preferred_element_type=jnp.float32)
                   + b_ref[...])
        else:
            # Single stacked MXU dot:  [h | adj@h] @ [[Ws],[Wn]]
            # Halves are written at lane offsets 0 and f_pad (a multiple of 128)
            # into the scratch slab, so no unaligned lane concat is needed.
            w_ref, b_ref = layer_refs[l]
            neigh = jnp.dot(adj, h, preferred_element_type=jnp.float32)
            lhs_ref[:, :f_in] = h
            lhs_ref[:, f_pad:f_pad + f_in] = neigh
            out = (jnp.dot(lhs_ref[...], w_ref[...],
                           preferred_element_type=jnp.float32)
                   + b_ref[...])
        if l < n_layers - 1:
            out = jax.nn.sigmoid(out)       # activation math kept in f32
        h = out

    # Readout over concat(features, h):  features == h0[:, :n_in] and the
    # "ones" columns of h0 carry zero readout weight (padded host-side), so
    #   concat(features, h) @ W_r + b_r == h0 @ W_r_feat_pad + h @ W_r_h + b_r
    ro = (jnp.dot(h0, wro_h0_ref[...], preferred_element_type=jnp.float32)
          + jnp.dot(h, wro_h_ref[...], preferred_element_type=jnp.float32)
          + bro_ref[...])
    o_ref[...] = ro.astype(o_ref.dtype)


def _cost_estimate(inputs, n, layer_dims, reassoc):
    flops = 0
    for (fi, fo), ra in zip(layer_dims, reassoc):
        if ra:
            flops += 2 * (2 * n * fi * fo + n * n * fo)
        else:
            flops += 2 * (n * n * fi + n * 2 * fi * fo)
    f0 = layer_dims[0][0]
    f_last = layer_dims[-1][1]
    flops += 2 * n * (f0 + f_last)                       # readout
    transcendentals = n * sum(fo for (_, fo) in layer_dims[:-1])   # sigmoids
    bytes_accessed = sum(int(a.size) * a.dtype.itemsize for a in inputs) + n * 4
    return pl.CostEstimate(flops=int(flops),
                           transcendentals=int(transcendentals),
                           bytes_accessed=int(bytes_accessed))


def gnn_forward(packed, adj_norm, h0):
    """Single fused pallas_call for the full GNN forward; returns (N, 1)."""
    n, _ = h0.shape
    reassoc = packed["reassoc"]
    f_pad = packed["f_pad"]

    inputs = [adj_norm, h0] + list(packed["layer_inputs"]) + [
        packed["ro_w_h0"], packed["ro_w_h"], packed["ro_b"]]

    kern = functools.partial(_gnn_fused_kernel, reassoc=reassoc, f_pad=f_pad)
    vmem = pl.BlockSpec(memory_space=pltpu.MemorySpace.VMEM)

    return pl.pallas_call(
        kern,
        out_shape=jax.ShapeDtypeStruct((n, 1), jnp.float32),
        in_specs=[vmem] * len(inputs),
        out_specs=vmem,
        scratch_shapes=[pltpu.VMEM((n, 2 * f_pad), jnp.float32)],
        compiler_params=pltpu.CompilerParams(vmem_limit_bytes=32 * 1024 * 1024),
        cost_estimate=_cost_estimate(inputs, n, packed["layer_dims"], reassoc),
    )(*inputs)


# ----------------------------------------------------------------------------
# Host-side packing (loop-invariant work hoisted out of the kernel)
# ----------------------------------------------------------------------------
def prepare_inputs(features, adj, dinv):
    n = features.shape[0]
    ones = jnp.ones((n, 7), features.dtype)               # matches torch.ones((N,7))
    h0 = jnp.concatenate([features, ones], axis=1)        # (N, n_in + 7)
    adj_norm = adj * dinv                                  # fold 1/in_degree (rows)
    return adj_norm, h0


def pack_params(params, n_in_feats, n_zeros):
    layer_dims = [tuple(ws.shape) for (ws, _, _) in params["layers"]]
    reassoc = tuple(fo < fi for (fi, fo) in layer_dims)
    max_fi = max(fi for (fi, _) in layer_dims)
    f_pad = _round_up(max_fi, 128)                         # 128-lane aligned halves

    layer_inputs = []
    for (ws, wn, b), ra in zip(params["layers"], reassoc):
        fi, fo = ws.shape
        if ra:
            layer_inputs += [ws, wn, b]
        else:
            w = jnp.zeros((2 * f_pad, fo), jnp.float32)
            w = w.at[:fi, :].set(ws)
            w = w.at[f_pad:f_pad + fi, :].set(wn)
            layer_inputs += [w, b]

    # Readout weight for the h0 operand: feature rows followed by zero rows for
    # the "ones" columns (so h0 @ ro_w_h0 == features @ ro_wf exactly).
    ro_w_h0 = jnp.concatenate(
        [params["ro_wf"], jnp.zeros((n_zeros, 1), jnp.float32)], axis=0)

    return {
        "layer_inputs": layer_inputs,
        "layer_dims": layer_dims,
        "reassoc": reassoc,
        "f_pad": f_pad,
        "ro_w_h0": ro_w_h0,
        "ro_w_h": params["ro_wh"],
        "ro_b": params["ro_b"],
    }


# ----------------------------------------------------------------------------
# Parameter / graph construction and a pure-JAX reference
# ----------------------------------------------------------------------------
def init_params(key, n_in_feats, n_zeros, n_h_feats, n_out_feats, n_gnn_lay):
    params = {"layers": []}
    tmp = n_in_feats + n_zeros
    dims = []
    for _ in range(n_gnn_lay - 1):
        dims.append((tmp, n_h_feats))
        tmp = n_h_feats
    dims.append((tmp, n_out_feats))
    for (fi, fo) in dims:
        key, k1, k2, k3 = jax.random.split(key, 4)
        scale = 1.0 / jnp.sqrt(jnp.float32(fi))
        ws = jax.random.normal(k1, (fi, fo), jnp.float32) * scale
        wn = jax.random.normal(k2, (fi, fo), jnp.float32) * scale
        b = jax.random.normal(k3, (1, fo), jnp.float32) * 0.01
        params["layers"].append((ws, wn, b))
    key, k1, k2, k3 = jax.random.split(key, 4)
    ro_in = n_out_feats + n_in_feats
    scale = 1.0 / jnp.sqrt(jnp.float32(ro_in))
    params["ro_wf"] = jax.random.normal(k1, (n_in_feats, 1), jnp.float32) * scale
    params["ro_wh"] = jax.random.normal(k2, (n_out_feats, 1), jnp.float32) * scale
    params["ro_b"] = jax.random.normal(k3, (1, 1), jnp.float32) * 0.01
    return params


def build_graph(key, n_nodes):
    """Deterministic small directed graph: ring + a few chords, weighted edges."""
    src, dst = [], []
    for i in range(n_nodes):
        src.append(i); dst.append((i + 1) % n_nodes)
        if i % 3 == 0:
            src.append(i); dst.append((i + 5) % n_nodes)
    src = jnp.array(src, jnp.int32)
    dst = jnp.array(dst, jnp.int32)
    w = jax.random.uniform(key, (src.shape[0],), jnp.float32, 0.1, 1.0)
    adj = jnp.zeros((n_nodes, n_nodes), jnp.float32).at[dst, src].add(w)
    deg = jnp.zeros((n_nodes,), jnp.float32).at[dst].add(1.0)
    dinv = jnp.where(deg > 0, 1.0 / deg, 0.0).reshape(n_nodes, 1)
    return adj, dinv


def reference_forward(params, adj, dinv, features):
    """Plain-JAX reference of the original (unfused) formulation."""
    n = features.shape[0]
    h = jnp.concatenate([features, jnp.ones((n, 7), features.dtype)], axis=1)
    for (ws, wn, b) in params["layers"][:-1]:
        neigh = dinv * (adj @ h)
        h = jax.nn.sigmoid(h @ ws + neigh @ wn + b)
    ws, wn, b = params["layers"][-1]
    neigh = dinv * (adj @ h)
    h = h @ ws + neigh @ wn + b
    return features @ params["ro_wf"] + h @ params["ro_wh"] + params["ro_b"]


if __name__ == "__main__":
    # Small, forward-consistent config (n_zeros is fixed to 7 by the forward()).
    N_NODES = 16
    N_IN, N_ZEROS, N_H, N_E, N_OUT, N_LAY = 3, 7, 32, 1, 8, 3

    key = jax.random.PRNGKey(0)
    k_feat, k_graph, k_param = jax.random.split(key, 3)

    # node features: (assets, outgoingLiabilities, incomingLiabilities) -> (N, 3)
    features = jax.random.uniform(k_feat, (N_NODES, N_IN), jnp.float32)
    adj, dinv = build_graph(k_graph, N_NODES)
    params = init_params(k_param, N_IN, N_ZEROS, N_H, N_OUT, N_LAY)

    adj_norm, h0 = prepare_inputs(features, adj, dinv)   # loop-invariant prep
    packed = pack_params(params, N_IN, N_ZEROS)

    out = gnn_forward(packed, adj_norm, h0)
    out = jax.block_until_ready(out)
    assert out.shape == (N_NODES, 1) and out.dtype == jnp.float32

    ref = jax.block_until_ready(reference_forward(params, adj, dinv, features))
    max_err = float(jnp.max(jnp.abs(out - ref)))
    assert jnp.allclose(out, ref, atol=1e-3, rtol=1e-3), f"max abs err {max_err}"

    # TODO(synk): GNN.predict() (per-graph batch split + softmax over nodes) is
    # outside the module's forward pass and is not implemented here.
    print("KERNEL_OK")
</pallas_src>

<mosaic_0001>
module attributes {stable_mosaic.version = 11 : i64} {
  func.func @_gnn_fused_kernel(%arg0: memref<16x16xf32, #tpu.memory_space<vmem>>, %arg1: memref<16x10xf32, #tpu.memory_space<vmem>>, %arg2: memref<256x32xf32, #tpu.memory_space<vmem>>, %arg3: memref<1x32xf32, #tpu.memory_space<vmem>>, %arg4: memref<256x32xf32, #tpu.memory_space<vmem>>, %arg5: memref<1x32xf32, #tpu.memory_space<vmem>>, %arg6: memref<32x8xf32, #tpu.memory_space<vmem>>, %arg7: memref<32x8xf32, #tpu.memory_space<vmem>>, %arg8: memref<1x8xf32, #tpu.memory_space<vmem>>, %arg9: memref<10x1xf32, #tpu.memory_space<vmem>>, %arg10: memref<8x1xf32, #tpu.memory_space<vmem>>, %arg11: memref<1x1xf32, #tpu.memory_space<vmem>>, %arg12: memref<16x1xf32, #tpu.memory_space<vmem>>, %arg13: memref<16x256xf32, #tpu.memory_space<vmem>>) attributes {dimension_semantics = [], scalar_prefetch = 0 : i64, scratch_operands = 1 : i64, tpu.core_type = #tpu.core_type<tc>} {
    %c0 = arith.constant 0 : index
    %c0_0 = arith.constant 0 : index
    %0 = vector.load %arg0[%c0, %c0_0] : memref<16x16xf32, #tpu.memory_space<vmem>>, vector<16x16xf32>
    %c0_1 = arith.constant 0 : index
    %c0_2 = arith.constant 0 : index
    %1 = vector.load %arg1[%c0_1, %c0_2] : memref<16x10xf32, #tpu.memory_space<vmem>>, vector<16x10xf32>
    %cst = arith.constant 0.000000e+00 : f32
    %2 = vector.broadcast %cst : f32 to vector<16x256xf32>
    %c0_3 = arith.constant 0 : index
    %c0_4 = arith.constant 0 : index
    %3 = vector.load %arg13[%c0_3, %c0_4] : memref<16x256xf32, #tpu.memory_space<vmem>>, vector<16x256xf32>
    tpu.vector_store %arg13[%c0_3, %c0_4], %2 {strides = array<i32>} : memref<16x256xf32, #tpu.memory_space<vmem>>, vector<16x256xf32>,
    %cst_5 = arith.constant dense<0.000000e+00> : vector<16x10xf32>
    %4 = tpu.matmul %0, %1, %cst_5 {dimension_numbers = #tpu.dot_dimension_numbers<[1], [0], [0], [1], [0, 0, 1, 1], [], []>} : vector<16x16xf32>, vector<16x10xf32>, vector<16x10xf32> -> vector<16x10xf32>
    %c0_6 = arith.constant 0 : index
    %c0_7 = arith.constant 0 : index
    %5 = vector.load %arg13[%c0_6, %c0_7] : memref<16x256xf32, #tpu.memory_space<vmem>>, vector<16x10xf32>
    tpu.vector_store %arg13[%c0_6, %c0_7], %1 {strides = array<i32>} : memref<16x256xf32, #tpu.memory_space<vmem>>, vector<16x10xf32>,
    %c0_8 = arith.constant 0 : index
    %c128 = arith.constant 128 : index
    %6 = vector.load %arg13[%c0_8, %c128] : memref<16x256xf32, #tpu.memory_space<vmem>>, vector<16x10xf32>
    tpu.vector_store %arg13[%c0_8, %c128], %4 {strides = array<i32>} : memref<16x256xf32, #tpu.memory_space<vmem>>, vector<16x10xf32>,
    %c0_9 = arith.constant 0 : index
    %c0_10 = arith.constant 0 : index
    %7 = vector.load %arg13[%c0_9, %c0_10] : memref<16x256xf32, #tpu.memory_space<vmem>>, vector<16x256xf32>
    %c0_11 = arith.constant 0 : index
    %c0_12 = arith.constant 0 : index
    %8 = vector.load %arg2[%c0_11, %c0_12] : memref<256x32xf32, #tpu.memory_space<vmem>>, vector<256x32xf32>
    %cst_13 = arith.constant dense<0.000000e+00> : vector<16x32xf32>
    %9 = tpu.matmul %7, %8, %cst_13 {dimension_numbers = #tpu.dot_dimension_numbers<[1], [0], [0], [1], [0, 0, 1, 1], [], []>} : vector<16x256xf32>, vector<256x32xf32>, vector<16x32xf32> -> vector<16x32xf32>
    %c0_14 = arith.constant 0 : index
    %c0_15 = arith.constant 0 : index
    %10 = vector.load %arg3[%c0_14, %c0_15] : memref<1x32xf32, #tpu.memory_space<vmem>>, vector<1x32xf32>
    %11 = vector.broadcast %10 : vector<1x32xf32> to vector<16x32xf32>
    %12 = arith.addf %9, %11 : vector<16x32xf32>
    %13 = arith.negf %12 : vector<16x32xf32>
    %14 = math.exp %13 : vector<16x32xf32>
    %cst_16 = arith.constant 1.000000e+00 : f32
    %15 = vector.broadcast %cst_16 : f32 to vector<16x32xf32>
    %16 = arith.addf %15, %14 : vector<16x32xf32>
    %17 = arith.divf %15, %16 : vector<16x32xf32>
    %cst_17 = arith.constant dense<0.000000e+00> : vector<16x32xf32>
    %18 = tpu.matmul %0, %17, %cst_17 {dimension_numbers = #tpu.dot_dimension_numbers<[1], [0], [0], [1], [0, 0, 1, 1], [], []>} : vector<16x16xf32>, vector<16x32xf32>, vector<16x32xf32> -> vector<16x32xf32>
    %c0_18 = arith.constant 0 : index
    %c0_19 = arith.constant 0 : index
    %19 = vector.load %arg13[%c0_18, %c0_19] : memref<16x256xf32, #tpu.memory_space<vmem>>, vector<16x32xf32>
    tpu.vector_store %arg13[%c0_18, %c0_19], %17 {strides = array<i32>} : memref<16x256xf32, #tpu.memory_space<vmem>>, vector<16x32xf32>,
    %c0_20 = arith.constant 0 : index
    %c128_21 = arith.constant 128 : index
    %20 = vector.load %arg13[%c0_20, %c128_21] : memref<16x256xf32, #tpu.memory_space<vmem>>, vector<16x32xf32>
    tpu.vector_store %arg13[%c0_20, %c128_21], %18 {strides = array<i32>} : memref<16x256xf32, #tpu.memory_space<vmem>>, vector<16x32xf32>,
    %c0_22 = arith.constant 0 : index
    %c0_23 = arith.constant 0 : index
    %21 = vector.load %arg13[%c0_22, %c0_23] : memref<16x256xf32, #tpu.memory_space<vmem>>, vector<16x256xf32>
    %c0_24 = arith.constant 0 : index
    %c0_25 = arith.constant 0 : index
    %22 = vector.load %arg4[%c0_24, %c0_25] : memref<256x32xf32, #tpu.memory_space<vmem>>, vector<256x32xf32>
    %cst_26 = arith.constant dense<0.000000e+00> : vector<16x32xf32>
    %23 = tpu.matmul %21, %22, %cst_26 {dimension_numbers = #tpu.dot_dimension_numbers<[1], [0], [0], [1], [0, 0, 1, 1], [], []>} : vector<16x256xf32>, vector<256x32xf32>, vector<16x32xf32> -> vector<16x32xf32>
    %c0_27 = arith.constant 0 : index
    %c0_28 = arith.constant 0 : index
    %24 = vector.load %arg5[%c0_27, %c0_28] : memref<1x32xf32, #tpu.memory_space<vmem>>, vector<1x32xf32>
    %25 = vector.broadcast %24 : vector<1x32xf32> to vector<16x32xf32>
    %26 = arith.addf %23, %25 : vector<16x32xf32>
    %27 = arith.negf %26 : vector<16x32xf32>
    %28 = math.exp %27 : vector<16x32xf32>
    %cst_29 = arith.constant 1.000000e+00 : f32
    %29 = vector.broadcast %cst_29 : f32 to vector<16x32xf32>
    %30 = arith.addf %29, %28 : vector<16x32xf32>
    %31 = arith.divf %29, %30 : vector<16x32xf32>
    %c0_30 = arith.constant 0 : index
    %c0_31 = arith.constant 0 : index
    %32 = vector.load %arg7[%c0_30, %c0_31] : memref<32x8xf32, #tpu.memory_space<vmem>>, vector<32x8xf32>
    %cst_32 = arith.constant dense<0.000000e+00> : vector<16x8xf32>
    %33 = tpu.matmul %31, %32, %cst_32 {dimension_numbers = #tpu.dot_dimension_numbers<[1], [0], [0], [1], [0, 0, 1, 1], [], []>} : vector<16x32xf32>, vector<32x8xf32>, vector<16x8xf32> -> vector<16x8xf32>
    %c0_33 = arith.constant 0 : index
    %c0_34 = arith.constant 0 : index
    %34 = vector.load %arg6[%c0_33, %c0_34] : memref<32x8xf32, #tpu.memory_space<vmem>>, vector<32x8xf32>
    %cst_35 = arith.constant dense<0.000000e+00> : vector<16x8xf32>
    %35 = tpu.matmul %31, %34, %cst_35 {dimension_numbers = #tpu.dot_dimension_numbers<[1], [0], [0], [1], [0, 0, 1, 1], [], []>} : vector<16x32xf32>, vector<32x8xf32>, vector<16x8xf32> -> vector<16x8xf32>
    %cst_36 = arith.constant dense<0.000000e+00> : vector<16x8xf32>
    %36 = tpu.matmul %0, %33, %cst_36 {dimension_numbers = #tpu.dot_dimension_numbers<[1], [0], [0], [1], [0, 0, 1, 1], [], []>} : vector<16x16xf32>, vector<16x8xf32>, vector<16x8xf32> -> vector<16x8xf32>
    %37 = arith.addf %35, %36 : vector<16x8xf32>
    %c0_37 = arith.constant 0 : index
    %c0_38 = arith.constant 0 : index
    %38 = vector.load %arg8[%c0_37, %c0_38] : memref<1x8xf32, #tpu.memory_space<vmem>>, vector<1x8xf32>
    %39 = vector.broadcast %38 : vector<1x8xf32> to vector<16x8xf32>
    %40 = arith.addf %37, %39 : vector<16x8xf32>
    %c0_39 = arith.constant 0 : index
    %c0_40 = arith.constant 0 : index
    %41 = vector.load %arg9[%c0_39, %c0_40] : memref<10x1xf32, #tpu.memory_space<vmem>>, vector<10x1xf32>
    %cst_41 = arith.constant dense<0.000000e+00> : vector<16x1xf32>
    %42 = tpu.matmul %1, %41, %cst_41 {dimension_numbers = #tpu.dot_dimension_numbers<[1], [0], [0], [1], [0, 0, 1, 1], [], []>} : vector<16x10xf32>, vector<10x1xf32>, vector<16x1xf32> -> vector<16x1xf32>
    %c0_42 = arith.constant 0 : index
    %c0_43 = arith.constant 0 : index
    %43 = vector.load %arg10[%c0_42, %c0_43] : memref<8x1xf32, #tpu.memory_space<vmem>>, vector<8x1xf32>
    %cst_44 = arith.constant dense<0.000000e+00> : vector<16x1xf32>
    %44 = tpu.matmul %40, %43, %cst_44 {dimension_numbers = #tpu.dot_dimension_numbers<[1], [0], [0], [1], [0, 0, 1, 1], [], []>} : vector<16x8xf32>, vector<8x1xf32>, vector<16x1xf32> -> vector<16x1xf32>
    %45 = arith.addf %42, %44 : vector<16x1xf32>
    %c0_45 = arith.constant 0 : index
    %c0_46 = arith.constant 0 : index
    %46 = vector.load %arg11[%c0_45, %c0_46] : memref<1x1xf32, #tpu.memory_space<vmem>>, vector<1x1xf32>
    %47 = vector.broadcast %46 : vector<1x1xf32> to vector<16x1xf32>
    %48 = arith.addf %45, %47 : vector<16x1xf32>
    %c0_47 = arith.constant 0 : index
    %c0_48 = arith.constant 0 : index
    %49 = vector.load %arg12[%c0_47, %c0_48] : memref<16x1xf32, #tpu.memory_space<vmem>>, vector<16x1xf32>
    tpu.vector_store %arg12[%c0_47, %c0_48], %48 {strides = array<i32>} : memref<16x1xf32, #tpu.memory_space<vmem>>, vector<16x1xf32>,
    return
  }
}

</mosaic_0001>

<bundles_post_ra>
// kernel: tpu_custom_call.1
= control target key start
LH: loop header
LB: loop body
LE: loop exit
PB: predicated region body
PF: predicated region fallthrough
CT: control target
= control target key end

     0   :  { %vm51_vm0 = vcmask 130048   ;;  %v1217_v2 = vmov 0.0   ;;  %vm133_vm1 = vcmask 80896   ;;  %vm343_vm2 = vcmask 261120   ;;  %s1579_s1 = inlined_call_operand.vmem [shape: f32[16,10], index: 1, kind: input, shape index: {}]   ;;  %s1580_s0 = inlined_call_operand.vmem [shape: f32[16,16], index: 0, kind: input, shape index: {}]   ;;  %s1581_s2 = inlined_call_operand.vmem [shape: f32[256,32], index: 2, kind: input, shape index: {}]   ;;  %s1582_s3 = inlined_call_operand.vmem [shape: f32[1,32], index: 3, kind: input, shape index: {}]   ;;  %s1583_s4 = inlined_call_operand.vmem [shape: f32[256,32], index: 4, kind: input, shape index: {}]   ;;  %s1584_s7 = inlined_call_operand.vmem [shape: f32[32,8], index: 7, kind: input, shape index: {}]   ;;  %s1585_s5 = inlined_call_operand.vmem [shape: f32[1,32], index: 5, kind: input, shape index: {}]   ;;  %s1586_s10 = inlined_call_operand.vmem [shape: f32[8,1], index: 10, kind: input, shape index: {}]   ;;  %s1587_s6 = inlined_call_operand.vmem [shape: f32[32,8], index: 6, kind: input, shape index: {}]   ;;  %s1588_s9 = inlined_call_operand.vmem [shape: f32[10,1], index: 9, kind: input, shape index: {}]   ;;  %s1589_s11 = inlined_call_operand.<no memory space> [shape: f32[1,1], index: 11, kind: input, shape index: {}]   ;;  %s1590_s8 = inlined_call_operand.vmem [shape: f32[1,8], index: 8, kind: input, shape index: {}]   ;;  %s1591_s12 = inlined_call_operand.vmem [shape: f32[16,1], index: 12, kind: output, shape index: {}]  }
   0x1   :  { %v1287_v0 = vld [vmem:[%s1579_s1] sm:$0xff]  ;;  %v1292_v1 = vld [vmem:[%s1579_s1 + $0x8] sm:$0xff]  ;;  %47 = vst [vmem:[#allocation2] sm:$0xff] %v1217_v2  ;;  %49 = vst [vmem:[#allocation2 + $0x10] sm:$0xff] %v1217_v2  ;;  %vm817_vm3 = vcmask 1041408   ;;  %vm1218_vm4 = vmmov 1  }
   0x2   :  { %48 = vst [vmem:[#allocation2 + $0x8] sm:$0xff] %v1217_v2  ;;  %50 = vst [vmem:[#allocation2 + $0x18] sm:$0xff] %v1217_v2  ;;  %v1297_v3 = vld [vmem:[%s1580_s0] sm:$0xff]  ;;  %v1097_v4 = vpack.c.bf16 %v1292_v1, %v1287_v0  ;;  %v159_v6 = vld [vmem:[%s1581_s2 + $0x88] sm:$0xff]  ;;  %vm729_vm6 = vcmask 64512   ;;  %vm905_vm7 = vcmask 7168  }
   0x3   :  { %134 = vst.msk [vmem:[#allocation2] sm:$0xff] %vm133_vm1, %v1287_v0  ;;  %135 = vst.msk [vmem:[#allocation2 + $0x10] sm:$0xff] %vm133_vm1, %v1292_v1  ;;  %1046 = vmatprep.mubr.msk.f32.mxu0 %vm51_vm0, %v1297_v3  ;;  %v158_v5 = vld [vmem:[%s1581_s2 + $0x80] sm:$0xff]  ;;  %v143_v9 = vld [vmem:[%s1581_s2 + $0x8] sm:$0xff] }
   0x4   :  { %v1101_v7 = vpack.c.bf16 %v159_v6, %v158_v5  ;;  %v142_v8 = vld [vmem:[%s1581_s2] sm:$0xff]  ;;  %v160_v10 = vld [vmem:[%s1581_s2 + $0x90] sm:$0xff]  ;;  %1098 = vmatprep.subr.bf16.mxu0 %v1097_v4  ;;  %v161_v12 = vld [vmem:[%s1581_s2 + $0x98] sm:$0xff] }
   0x5   :  { %v1103_v11 = vpack.c.bf16 %v143_v9, %v142_v8  ;;  %v144_v13 = vld [vmem:[%s1581_s2 + $0x10] sm:$0xff]  ;;  %v145_v14 = vld [vmem:[%s1581_s2 + $0x18] sm:$0xff]  ;;  %1100 = vmatpush3.bf16.msra.mxu0 %v1097_v4  ;;  %v1334_v15 = vld [vmem:[%s1580_s0 + $0x8] sm:$0xff]  ;;  %v1105_v16 = vpack.c.bf16 %v161_v12, %v160_v10 }
   0x6   :  { %1102 = vmatprep.subr.bf16.mxu1 %v1101_v7  ;;  %v162_v17 = vld [vmem:[%s1581_s2 + $0xa0] sm:$0xff]  ;;  %v163_v18 = vld [vmem:[%s1581_s2 + $0xa8] sm:$0xff]  ;;  %v1107_v19 = vpack.c.bf16 %v145_v14, %v144_v13  ;;  %v164_v23 = vld [vmem:[%s1581_s2 + $0xb0] sm:$0xff] }
   0x7   :  { %1104 = vmatpush3.bf16.msra.mxu1 %v1103_v11  ;;  %v1109_v20 = vpack.c.bf16 %v163_v18, %v162_v17  ;;  %v146_v21 = vld [vmem:[%s1581_s2 + $0x20] sm:$0xff]  ;;  %v147_v22 = vld [vmem:[%s1581_s2 + $0x28] sm:$0xff]  ;;  %v165_v24 = vld [vmem:[%s1581_s2 + $0xb8] sm:$0xff] }
   0x8   :  { %1106 = vmatprep.subr.bf16.mxu1 %v1105_v16  ;;  %1047 = vmatmul.mubr.msk.f32.vlgmr.msra.gmra.mrb[0].mxu0 %vm51_vm0, %v1334_v15  ;;  %v1111_v25 = vpack.c.bf16 %v147_v22, %v146_v21  ;;  %v1113_v26 = vpack.c.bf16 %v165_v24, %v164_v23  ;;  %v148_v27 = vld [vmem:[%s1581_s2 + $0x30] sm:$0xff]  ;;  %v149_v28 = vld [vmem:[%s1581_s2 + $0x38] sm:$0xff]  ;;  %v166_v29 = vld [vmem:[%s1581_s2 + $0xc0] sm:$0xff] }
   0x9   :  { %1053 = vmatprep.mubr.msk.f32.mxu0 %vm51_vm0, %v1297_v3  ;;  %v167_v30 = vld [vmem:[%s1581_s2 + $0xc8] sm:$0xff]  ;;  %v1115_v31 = vpack.c.bf16 %v149_v28, %v148_v27  ;;  %v150_v33 = vld [vmem:[%s1581_s2 + $0x40] sm:$0xff]  ;;  %v168_v35 = vld [vmem:[%s1581_s2 + $0xd0] sm:$0xff] }
   0xa   :  { %v1117_v32 = vpack.c.bf16 %v167_v30, %v166_v29  ;;  %v151_v34 = vld [vmem:[%s1581_s2 + $0x48] sm:$0xff]  ;;  %v169_v36 = vld [vmem:[%s1581_s2 + $0xd8] sm:$0xff]  ;;  %v152_v39 = vld [vmem:[%s1581_s2 + $0x50] sm:$0xff] }
   0xb   :  { %1108 = vmatpush3.bf16.msra.mxu1 %v1107_v19  ;;  %v1119_v37 = vpack.c.bf16 %v151_v34, %v150_v33  ;;  %v1121_v38 = vpack.c.bf16 %v169_v36, %v168_v35  ;;  %v153_v40 = vld [vmem:[%s1581_s2 + $0x58] sm:$0xff]  ;;  %v170_v42 = vld [vmem:[%s1581_s2 + $0xe0] sm:$0xff]  ;;  %v171_v43 = vld [vmem:[%s1581_s2 + $0xe8] sm:$0xff] }
   0xc   :  { %1110 = vmatprep.subr.bf16.mxu1 %v1109_v20  ;;  %v1123_v41 = vpack.c.bf16 %v153_v40, %v152_v39  ;;  %v1125_v44 = vpack.c.bf16 %v171_v43, %v170_v42  ;;  %v154_v45 = vld [vmem:[%s1581_s2 + $0x60] sm:$0xff]  ;;  %v155_v46 = vld [vmem:[%s1581_s2 + $0x68] sm:$0xff]  ;;  %v172_v48 = vld [vmem:[%s1581_s2 + $0xf0] sm:$0xff] }
   0xd   :  { %v1127_v47 = vpack.c.bf16 %v155_v46, %v154_v45  ;;  %v173_v49 = vld [vmem:[%s1581_s2 + $0xf8] sm:$0xff]  ;;  %v156_v50 = vld [vmem:[%s1581_s2 + $0x70] sm:$0xff]  ;;  %v138_v56 = vld [vmem:[#allocation2] sm:$0xff] }
   0xe   :  { %v1129_v51 = vpack.c.bf16 %v173_v49, %v172_v48  ;;  %v157_v52 = vld [vmem:[%s1581_s2 + $0x78] sm:$0xff]  ;;  %v140_v59 = vld [vmem:[#allocation2 + $0x10] sm:$0xff]  ;;  %v914_v61 = vld [vmem:[%s1582_s3] ss:$0 sm:$0xff] }
   0xf   :  { %1112 = vmatpush3.bf16.msra.mxu1 %v1111_v25  ;;  %v1131_v53 = vpack.c.bf16 %v157_v52, %v156_v50  ;;  %v368_v16 = vld [vmem:[%s1583_s4 + $0x80] sm:$0xff]  ;;  %v369_v17 = vld [vmem:[%s1583_s4 + $0x88] sm:$0xff]  ;;  %v370_v23 = vld [vmem:[%s1583_s4 + $0x90] sm:$0xff] }
  0x10   :  { %1114 = vmatprep.subr.bf16.mxu1 %v1113_v26  ;;  %v1137_v20 = vpack.c.bf16 %v369_v17, %v368_v16  ;;  %v352_v21 = vld [vmem:[%s1583_s4] sm:$0xff]  ;;  %v353_v22 = vld [vmem:[%s1583_s4 + $0x8] sm:$0xff]  ;;  %v371_v24 = vld [vmem:[%s1583_s4 + $0x98] sm:$0xff] }
  0x11   :  { %v1139_v25 = vpack.c.bf16 %v353_v22, %v352_v21  ;;  %v1141_v26 = vpack.c.bf16 %v371_v24, %v370_v23  ;;  %v354_v27 = vld [vmem:[%s1583_s4 + $0x10] sm:$0xff]  ;;  %v355_v28 = vld [vmem:[%s1583_s4 + $0x18] sm:$0xff]  ;;  %v372_v29 = vld [vmem:[%s1583_s4 + $0xa0] sm:$0xff] }
  0x12   :  { %v373_v30 = vld [vmem:[%s1583_s4 + $0xa8] sm:$0xff]  ;;  %v356_v33 = vld [vmem:[%s1583_s4 + $0x20] sm:$0xff]  ;;  %v374_v35 = vld [vmem:[%s1583_s4 + $0xb0] sm:$0xff] }
  0x13   :  { %1116 = vmatpush3.bf16.msra.mxu1 %v1115_v31  ;;  %v1143_v31 = vpack.c.bf16 %v355_v28, %v354_v27  ;;  %v357_v34 = vld [vmem:[%s1583_s4 + $0x28] sm:$0xff]  ;;  %v375_v36 = vld [vmem:[%s1583_s4 + $0xb8] sm:$0xff]  ;;  %v358_v39 = vld [vmem:[%s1583_s4 + $0x30] sm:$0xff] }
  0x14   :  { %1118 = vmatprep.subr.bf16.mxu1 %v1117_v32  ;;  %v1145_v32 = vpack.c.bf16 %v373_v30, %v372_v29  ;;  %v359_v40 = vld [vmem:[%s1583_s4 + $0x38] sm:$0xff]  ;;  %v377_v42 = vld [vmem:[%s1583_s4 + $0xc8] sm:$0xff]  ;;  %v360_v45 = vld [vmem:[%s1583_s4 + $0x40] sm:$0xff] }
  0x15   :  { %v1151_v43 = vpack.c.bf16 %v359_v40, %v358_v39  ;;  %v361_v46 = vld [vmem:[%s1583_s4 + $0x48] sm:$0xff]  ;;  %v379_v48 = vld [vmem:[%s1583_s4 + $0xd8] sm:$0xff]  ;;  %vm1190_vm5 = vmpackc.low %vm817_vm3, %vm1218_vm4 }
  0x16   :  { %v1155_v49 = vpack.c.bf16 %v361_v46, %v360_v45  ;;  %v363_v52 = vld [vmem:[%s1583_s4 + $0x58] sm:$0xff]  ;;  %v727_v45 = vld [vmem:[%s1588_s9 + $0x8] sm:$0x3] }
  0x17   :  { %1120 = vmatpush3.bf16.msra.mxu1 %v1119_v37  ;;  %v1147_v37 = vpack.c.bf16 %v357_v34, %v356_v33  ;;  %v481_v16 = vld [vmem:[%s1584_s7 + $0x18] sm:$0xff] }
  0x18   :  { %1122 = vmatprep.subr.bf16.mxu1 %v1121_v38  ;;  %v1149_v38 = vpack.c.bf16 %v375_v36, %v374_v35  ;;  %v728_v35 = vld [vmem:[%s1586_s10] sm:$0xff] }
  0x19   :  { %v563_v36 = vld [vmem:[%s1587_s6] sm:$0xff] }
  0x1b   :  { %1124 = vmatpush3.bf16.msra.mxu1 %v1123_v41  ;;  %v376_v41 = vld [vmem:[%s1583_s4 + $0xc0] sm:$0xff] }
  0x1c   :  { %1126 = vmatprep.subr.bf16.mxu1 %v1125_v44  ;;  %v1153_v44 = vpack.c.bf16 %v377_v42, %v376_v41  ;;  %v566_v42 = vld [vmem:[%s1587_s6 + $0x18] sm:$0xff] }
  0x1f   :  { %1128 = vmatpush3.bf16.msra.mxu1 %v1127_v47  ;;  %v378_v47 = vld [vmem:[%s1583_s4 + $0xd0] sm:$0xff] }
  0x20   :  { %1130 = vmatprep.subr.bf16.mxu1 %v1129_v51  ;;  %v1157_v50 = vpack.c.bf16 %v379_v48, %v378_v47  ;;  %v362_v51 = vld [vmem:[%s1583_s4 + $0x50] sm:$0xff]  ;;  %v928_v47 = vld [vmem:[%s1590_s8] ss:$0 sm:$0xff] }
  0x23   :  { %1132 = vmatpush3.bf16.msra.mxu1 %v1131_v53  ;;  %v1159_v53 = vpack.c.bf16 %v363_v52, %v362_v51 }
  0xdb   :  { %v1048_v54 = vpop.f32.mrb[0].mxu0 }
  0xdc   :  { %137 = vst.msk [vmem:[#allocation2 + $0x18] sm:$0xff] %vm133_vm1, %v1048_v54  ;;  %v124_v55 = vpop.f32.mrb[1].mxu0  ;;  %v380_v54 = vld [vmem:[%s1583_s4 + $0xe0] sm:$0xff] }
  0xdd   :  { %136 = vst.msk [vmem:[#allocation2 + $0x8] sm:$0xff] %vm133_vm1, %v124_v55  ;;  %v381_v55 = vld [vmem:[%s1583_s4 + $0xe8] sm:$0xff] }
  0xe3   :  { %v141_v58 = vld [vmem:[#allocation2 + $0x18] sm:$0xff] }
  0xe4   :  { %v139_v57 = vld [vmem:[#allocation2 + $0x8] sm:$0xff] }
  0xe5   :  { %245 = vmatprep.mubr.f32.mxu1 %v139_v57  ;;  %v364_v57 = vld [vmem:[%s1583_s4 + $0x60] sm:$0xff] }
  0xe6   :  { %246 = vmatmul.mubr.f32.vlgmr.msra.gmra.mrb[0].mxu1 %v138_v56  ;;  %v1161_v56 = vpack.c.bf16 %v381_v55, %v380_v54 }
  0xe7   :  { %250 = vmatprep.mubr.f32.mxu1 %v141_v58  ;;  %v365_v58 = vld [vmem:[%s1583_s4 + $0x68] sm:$0xff] }
  0xea   :  { %251 = vmatmul.mubr.f32.gmra.mrb[2].mxu1 %v140_v59  ;;  %v1163_v59 = vpack.c.bf16 %v365_v58, %v364_v57 }
 0x1b9   :  { %v971_v60 = vpop.f32.mrb[0].mxu1 }
 0x1ba   :  { %v972_v62 = vpop.f32.mrb[1].mxu1 }
 0x1bb   :  { %v973_v63 = vadd.f32 %v972_v62, %v971_v60  ;;  %v382_v60 = vld [vmem:[%s1583_s4 + $0xf0] sm:$0xff] }
 0x1bc   :  { %v366_v62 = vld [vmem:[%s1583_s4 + $0x70] sm:$0xff] }
 0x1bd   :  { %v248_v2 = vadd.f32 %v973_v63, %v914_v61  ;;  %v974_v4 = vpop.f32.mrb[2].mxu1 }
 0x1be   :  { %v975_v5 = vpop.f32.mrb[3].mxu1 }
 0x1bf   :  { %v915_v6 = vmul.f32 -1.442695, %v248_v2  ;;  %v976_v7 = vadd.f32 %v975_v5, %v974_v4  ;;  %v367_v2 = vld [vmem:[%s1583_s4 + $0x78] sm:$0xff] }
 0x1c0   :  { %v1167_v4 = vpack.c.bf16 %v367_v2, %v366_v62 }
 0x1c1   :  { %1201 = vpow2.f32 %v915_v6  ;;  %v253_v8 = vadd.f32 %v976_v7, %v914_v61  ;;  %v383_v61 = vld [vmem:[%s1583_s4 + $0xf8] sm:$0xff] }
 0x1c2   :  { %v1165_v63 = vpack.c.bf16 %v383_v61, %v382_v60 }
 0x1c3   :  { %v916_v9 = vmul.f32 -1.442695, %v253_v8 }
 0x1c5   :  { %1203 = vpow2.f32 %v916_v9 }
 0x1cb   :  { %v1202_v10 = vpop.eup %1201 }
 0x1cc   :  { %v262_v11 = vadd.f32 1.0, %v1202_v10 }
 0x1ce   :  { %1205 = vrcp.f32 %v262_v11  ;;  %v478_v11 = vld [vmem:[%s1584_s7] sm:$0xff] }
 0x1cf   :  { %v1204_v12 = vpop.eup %1203 }
 0x1d0   :  { %v263_v13 = vadd.f32 1.0, %v1204_v12  ;;  %v479_v12 = vld [vmem:[%s1584_s7 + $0x8] sm:$0xff] }
 0x1d2   :  { %1207 = vrcp.f32 %v263_v13  ;;  %v480_v13 = vld [vmem:[%s1584_s7 + $0x10] sm:$0xff] }
 0x1d3   :  { %v1173_v17 = vpack.c.bf16 %v481_v16, %v480_v13 }
 0x1d8   :  { %v1206_v14 = vpop.eup %1205 }
 0x1d9   :  { %344 = vst.msk [vmem:[#allocation2] sm:$0xff] %vm343_vm2, %v1206_v14 }
 0x1dc   :  { %v1208_v18 = vpop.eup %1207 }
 0x1dd   :  { %v1133_v19 = vpack.c.bf16 %v1208_v18, %v1206_v14  ;;  %345 = vst.msk [vmem:[#allocation2 + $0x10] sm:$0xff] %vm343_vm2, %v1208_v18  ;;  %v1169_v14 = vpack.c.bf16 %v479_v12, %v478_v11 }
 0x1df   :  { %1134 = vmatprep.subr.bf16.mxu0 %v1133_v19  ;;  %1170 = vmatprep.subr.bf16.mxu1 %v1169_v14 }
 0x1e0   :  { %1136 = vmatpush3.bf16.msra.mxu0 %v1133_v19  ;;  %v348_v8 = vld [vmem:[#allocation2] sm:$0xff]  ;;  %1172 = vmatpush3.bf16.msra.mxu1 %v1169_v14 }
 0x1e1   :  { %1138 = vmatprep.subr.bf16.mxu0 %v1137_v20  ;;  %1174 = vmatprep.subr.bf16.mxu1 %v1173_v17  ;;  %v919_v19 = vld [vmem:[%s1585_s5] ss:$0 sm:$0xff] }
 0x1e3   :  { %1054 = vmatmul.mubr.msk.f32.vlgmr.msra.gmra.mrb[2].mxu0 %vm51_vm0, %v1334_v15 }
 0x1e4   :  { %1140 = vmatpush3.bf16.msra.mxu0 %v1139_v25  ;;  %v350_v10 = vld [vmem:[#allocation2 + $0x10] sm:$0xff]  ;;  %1176 = vmatpush3.bf16.msra.mxu1 %v1173_v17 }
 0x1e5   :  { %1142 = vmatprep.subr.bf16.mxu0 %v1141_v26 }
 0x1e8   :  { %1144 = vmatpush3.bf16.msra.mxu0 %v1143_v31 }
 0x1e9   :  { %1146 = vmatprep.subr.bf16.mxu0 %v1145_v32 }
 0x1ec   :  { %1148 = vmatpush3.bf16.msra.mxu0 %v1147_v37  ;;  %v564_v37 = vld [vmem:[%s1587_s6 + $0x8] sm:$0xff] }
 0x1ed   :  { %1150 = vmatprep.subr.bf16.mxu0 %v1149_v38  ;;  %v1181_v41 = vpack.c.bf16 %v564_v37, %v563_v36 }
 0x1f0   :  { %1152 = vmatpush3.bf16.msra.mxu0 %v1151_v43 }
 0x1f1   :  { %1154 = vmatprep.subr.bf16.mxu0 %v1153_v44  ;;  %v726_v44 = vld [vmem:[%s1588_s9] sm:$0xff] }
 0x1f2   :  { %v1189_v46 = vpack.c.bf16 %v727_v45, %v726_v44 }
 0x1f4   :  { %1156 = vmatpush3.bf16.msra.mxu0 %v1155_v49 }
 0x1f5   :  { %1158 = vmatprep.subr.bf16.mxu0 %v1157_v50 }
 0x1f8   :  { %1160 = vmatpush3.bf16.msra.mxu0 %v1159_v53 }
 0x1f9   :  { %1162 = vmatprep.subr.bf16.mxu0 %v1161_v56 }
 0x1fc   :  { %1164 = vmatpush3.bf16.msra.mxu0 %v1163_v59 }
 0x1fd   :  { %1166 = vmatprep.subr.bf16.mxu0 %v1165_v63 }
 0x200   :  { %1168 = vmatpush3.bf16.msra.mxu0 %v1167_v4 }
 0x201   :  { %1085 = vmatprep.subr.mxu0 %v728_v35 }
 0x2b6   :  { %v1055_v5 = vpop.f32.mrb[2].mxu0 }
 0x2b7   :  { %347 = vst.msk [vmem:[#allocation2 + $0x18] sm:$0xff] %vm343_vm2, %v1055_v5  ;;  %v334_v6 = vpop.f32.mrb[3].mxu0 }
 0x2b8   :  { %346 = vst.msk [vmem:[#allocation2 + $0x8] sm:$0xff] %vm343_vm2, %v334_v6 }
 0x2be   :  { %v351_v9 = vld [vmem:[#allocation2 + $0x18] sm:$0xff] }
 0x2bf   :  { %v349_v7 = vld [vmem:[#allocation2 + $0x8] sm:$0xff] }
 0x2c0   :  { %455 = vmatprep.mubr.f32.mxu0 %v349_v7 }
 0x2c1   :  { %456 = vmatmul.mubr.f32.vlgmr.msra.gmra.mrb[4].mxu0 %v348_v8 }
 0x2c2   :  { %460 = vmatprep.mubr.f32.mxu0 %v351_v9  ;;  %1086 = vmatpush3.msra.mxu0 %v728_v35 }
 0x2c3   :  { %1191 = vmatprep.subr.msk.bf16.mxu0 %vm1190_vm5, %v1189_v46 }
 0x2c5   :  { %461 = vmatmul.mubr.f32.gmra.mrb[6].mxu0 %v350_v10 }
 0x394   :  { %v1013_v18 = vpop.f32.mrb[4].mxu0 }
 0x395   :  { %v1014_v20 = vpop.f32.mrb[5].mxu0 }
 0x396   :  { %v1015_v21 = vadd.f32 %v1014_v20, %v1013_v18 }
 0x398   :  { %v458_v22 = vadd.f32 %v1015_v21, %v919_v19  ;;  %v1016_v23 = vpop.f32.mrb[6].mxu0 }
 0x399   :  { %v1017_v24 = vpop.f32.mrb[7].mxu0 }
 0x39a   :  { %v920_v25 = vmul.f32 -1.442695, %v458_v22  ;;  %v1018_v26 = vadd.f32 %v1017_v24, %v1016_v23 }
 0x39c   :  { %1209 = vpow2.f32 %v920_v25  ;;  %v463_v27 = vadd.f32 %v1018_v26, %v919_v19 }
 0x39e   :  { %v921_v28 = vmul.f32 -1.442695, %v463_v27 }
 0x3a0   :  { %1211 = vpow2.f32 %v921_v28 }
 0x3a6   :  { %v1210_v29 = vpop.eup %1209 }
 0x3a7   :  { %v472_v30 = vadd.f32 1.0, %v1210_v29 }
 0x3a9   :  { %1213 = vrcp.f32 %v472_v30 }
 0x3aa   :  { %v1212_v31 = vpop.eup %1211 }
 0x3ab   :  { %v473_v32 = vadd.f32 1.0, %v1212_v31 }
 0x3ad   :  { %1215 = vrcp.f32 %v473_v32 }
 0x3b3   :  { %v1214_v33 = vpop.eup %1213 }
 0x3b4   :  { %1064 = vmatprep.mubr.msk.f32.mxu1 %vm343_vm2, %v1214_v33 }
 0x3b7   :  { %v1216_v34 = vpop.eup %1215 }
 0x3b8   :  { %1065 = vmatmul.mubr.msk.f32.vlgmr.msra.gmra.mrb[4].mxu1 %vm343_vm2, %v1216_v34 }
 0x3b9   :  { %1071 = vmatprep.mubr.msk.f32.mxu1 %vm51_vm0, %v1297_v3  ;;  %v565_v3 = vld [vmem:[%s1587_s6 + $0x10] sm:$0xff] }
 0x3ba   :  { %v1185_v43 = vpack.c.bf16 %v566_v42, %v565_v3 }
 0x48b   :  { %v1066_v38 = vpop.f32.mrb[4].mxu1 }
 0x48c   :  { %v554_v39 = vpop.f32.mrb[5].mxu1 }
 0x48d   :  { %v1177_v40 = vpack.c.bf16 %v1066_v38, %v554_v39 }
 0x48f   :  { %1178 = vmatprep.subr.bf16.mxu1 %v1177_v40 }
 0x490   :  { %1180 = vmatpush3.bf16.msra.mxu1 %v1177_v40 }
 0x491   :  { %1182 = vmatprep.subr.bf16.mxu1 %v1181_v41 }
 0x493   :  { %1072 = vmatmul.mubr.msk.f32.vlgmr.msra.gmra.mrb[6].mxu1 %vm51_vm0, %v1334_v15  ;;  %v17_v15 = vstv %s1589_s11 }
 0x494   :  { %1184 = vmatpush3.bf16.msra.mxu1 %v1181_v41  ;;  %1082 = vmatprep.mubr.msk.f32.mxu1 %vm343_vm2, %v1214_v33  ;;  %18 = vst [vmem:[#allocation3] sm:$0x1] %v17_v15 }
 0x495   :  { %1186 = vmatprep.subr.bf16.mxu1 %v1185_v43 }
 0x498   :  { %1188 = vmatpush3.bf16.msra.mxu1 %v1185_v43 }
 0x49b   :  { %1083 = vmatmul.mubr.msk.f32.vlgmr.msra.gmra.mrb[6].mxu1 %vm343_vm2, %v1216_v34  ;;  %v934_v52 = vld [vmem:[#allocation3] ss:$0 sm:$0xff] }
 0x56e   :  { %v1084_v48 = vpop.f32.mrb[6].mxu1 }
 0x56f   :  { %v708_v49 = vpop.f32.mrb[7].mxu1  ;;  %v725_v51 = vadd.f32 %v1084_v48, %v928_v47 }
 0x570   :  { %v724_v50 = vadd.f32 %v928_v47, %v708_v49 }
 0x572   :  { %1087 = vmatprep.mubr.msk.f32.mxu0 %vm729_vm6, %v724_v50 }
 0x573   :  { %1088 = vmatmul.mubr.msk.f32.vlgmr.msra.gmra.mrb[8].mxu0 %vm729_vm6, %v725_v51 }
 0x574   :  { %1194 = vmatpush3.bf16.msk.msra.mxu0 %vm1190_vm5, %v1189_v46  ;;  %1094 = vmatprep.mubr.msk.f32.mxu0 %vm133_vm1, %v1287_v0 }
 0x57b   :  { %1095 = vmatmul.mubr.msk.f32.vlgmr.msra.gmra.mrb[8].mxu0 %vm133_vm1, %v1292_v1 }
 0x64e   :  { %v1096_v53 = vpop.f32.mrb[8].mxu0 }
 0x64f   :  { %v904_v54 = vadd.f32 %v1096_v53, %v934_v52  ;;  %v887_v55 = vpop.f32.mrb[9].mxu0 }
 0x650   :  { %v903_v56 = vadd.f32 %v934_v52, %v887_v55 }
 0x651   :  { %907 = vst.msk [vmem:[%s1591_s12 + $0x8] sm:$0xff] %vm905_vm7, %v904_v54 }
 0x652   :  { %906 = vst.msk [vmem:[%s1591_s12] sm:$0xff] %vm905_vm7, %v903_v56 }

</bundles_post_ra>
